<compile_context>
chip_gen: v7x
topology: tpu7x:2x2x1
jax: 0.10.0
libtpu: 0.0.40
codegen_flags: <defaults>
</compile_context>

<pallas_src>
import jax
import jax.numpy as jnp
from jax.experimental import pallas as pl
from jax.experimental.pallas import tpu as pltpu

BN_EPS = 1e-5
_LANE = 128
_TARGET_STEP_BYTES = 1 << 20      # aim ~1 MiB of streamed HBM traffic per step


def _vmem_limit_bytes():
    cap = 64 * 1024 * 1024
    try:
        cap = int(getattr(pltpu.get_tpu_info(), "vmem_capacity_bytes", cap))
    except Exception:
        pass
    # ~75% of physical VMEM, capped (v5e/v6e: 128 MiB -> 96 MiB, v7x: 64 -> 48).
    return min(int(cap * 0.75), 100 * 1024 * 1024)


def _largest_divisor_leq(n, cap):
    cap = max(1, min(n, cap))
    for d in range(cap, 0, -1):
        if n % d == 0:
            return d
    return 1


def _plan_tiles(N, Cin, Cout, L, in_bytes, out_bytes, vmem_limit):
    """Pick (BN, TL): samples per block and lane-tile size from the VMEM budget."""
    budget = int(vmem_limit * 0.6)           # headroom for temps / pipeline state
    # Double-buffered in/out blocks + f32 temps, per lane, per sample.
    per_lane = 2 * Cin * in_bytes + 2 * Cout * out_bytes + 4 * (Cin + Cout)
    stream_per_lane = Cin * in_bytes + Cout * out_bytes

    tl_cap = max(budget // per_lane, _LANE)
    tl_want = max(_TARGET_STEP_BYTES // max(stream_per_lane, 1), 4096)
    TL = min(tl_cap, tl_want)
    if TL >= L:
        TL = L                               # full-L block (any length is legal)
    else:
        TL = max((TL // _LANE) * _LANE, _LANE)

    BN = 1
    step_bytes = TL * stream_per_lane
    if step_bytes < _TARGET_STEP_BYTES and N > 1:
        want_bn = -(-_TARGET_STEP_BYTES // step_bytes)       # ceil
        fit_bn = max(budget // (per_lane * TL), 1)
        BN = _largest_divisor_leq(N, min(want_bn, fit_bn))
    return BN, TL


def _make_stats_kernel(BN, Cin, TL, L, blocks_per_split):
    needs_mask = (L % TL) != 0

    def kernel(x_ref, sum_ref, gram_ref):
        # x_ref: (BN, Cin, TL) ; sum_ref: (Cin, 1) ; gram_ref: (Cin, Cin)
        @pl.when(pl.program_id(2) == 0)
        def _init():
            sum_ref[...] = jnp.zeros_like(sum_ref)
            gram_ref[...] = jnp.zeros_like(gram_ref)

        if needs_mask:
            gblk = pl.program_id(1) * blocks_per_split + pl.program_id(2)
            valid = L - gblk * TL
            lane = jax.lax.broadcasted_iota(jnp.int32, (1, TL), 1)
            mask = lane < valid

        s_acc = jnp.zeros((Cin, 1), jnp.float32)
        g_acc = jnp.zeros((Cin, Cin), jnp.float32)
        for i in range(BN):                          # static unroll, BN small
            x = x_ref[i].astype(jnp.float32)         # (Cin, TL)
            if needs_mask:
                x = jnp.where(mask, x, 0.0)
            s_acc = s_acc + jnp.sum(x, axis=1, keepdims=True)
            # X @ X^T, contracting the lane axis of both operands.
            # TODO(synk): verify via pl.lower_as_mlir that Mosaic lowers this
            # without materializing an XLU transpose of the (Cin, TL) tile.
            g_acc = g_acc + jax.lax.dot_general(
                x, x, dimension_numbers=(((1,), (1,)), ((), ())),
                preferred_element_type=jnp.float32)
        sum_ref[...] += s_acc
        gram_ref[...] += g_acc

    return kernel


def _make_conv_kernel(BN):
    def kernel(x_ref, w_ref, b_ref, o_ref):
        # x_ref: (BN, Cin, TL) ; w_ref: (Cout, Cin) ; b_ref: (Cout, 1)
        # o_ref: (BN, Cout, TL)
        w = w_ref[...]
        b = b_ref[...]
        for i in range(BN):                          # static unroll, BN small
            x = x_ref[i].astype(jnp.float32)
            y = jnp.dot(w, x, preferred_element_type=jnp.float32) + b
            o_ref[i] = jnp.maximum(y, 0.0).astype(o_ref.dtype)

    return kernel


def base_bc_forward(x_ncl, conv_w, conv_b, bn_gamma=None, bn_beta=None,
                    with_bn=True, _tile_override=None):
    """x_ncl: (N, C_in, L). conv_w: (C_out, C_in, 1). conv_b: (C_out,)."""
    N, Cin, L = x_ncl.shape
    Cout = conv_w.shape[0]

    w2d = conv_w[:, :, 0].astype(jnp.float32)        # (Cout, Cin)
    in_bytes = jnp.dtype(x_ncl.dtype).itemsize
    out_bytes = in_bytes                             # output kept in input dtype
    vmem_limit = _vmem_limit_bytes()

    if _tile_override is not None:
        BNb, TL = _tile_override
    else:
        BNb, TL = _plan_tiles(N, Cin, Cout, L, in_bytes, out_bytes, vmem_limit)
    assert N % BNb == 0, "batch block must divide N"
    num_nb = N // BNb
    num_l = pl.cdiv(L, TL)

    if with_bn:
        # Extra parallel split of the L tiles for the stats pass when the
        # batch-block grid can't feed both TensorCores (v7x megacore).
        lsplit = 2 if (num_nb == 1 and num_l >= 2 and num_l % 2 == 0) else 1
        bps = num_l // lsplit

        # ---- Pass 1: streamed statistics of the input ----
        sum_p, gram_p = pl.pallas_call(
            _make_stats_kernel(BNb, Cin, TL, L, bps),
            out_shape=(
                jax.ShapeDtypeStruct((num_nb, lsplit, Cin, 1), jnp.float32),
                jax.ShapeDtypeStruct((num_nb, lsplit, Cin, Cin), jnp.float32)),
            grid=(num_nb, lsplit, bps),
            in_specs=[pl.BlockSpec((BNb, Cin, TL),
                                   lambda nb, s, l: (nb, 0, s * bps + l))],
            out_specs=(pl.BlockSpec((None, None, Cin, 1),
                                    lambda nb, s, l: (nb, s, 0, 0)),
                       pl.BlockSpec((None, None, Cin, Cin),
                                    lambda nb, s, l: (nb, s, 0, 0))),
            compiler_params=pltpu.CompilerParams(
                dimension_semantics=("parallel", "parallel", "arbitrary"),
                vmem_limit_bytes=vmem_limit),
            cost_estimate=pl.CostEstimate(
                flops=2 * N * L * Cin * Cin + N * L * Cin,
                transcendentals=0,
                bytes_accessed=in_bytes * N * Cin * L
                + 4 * num_nb * lsplit * Cin * (Cin + 1)),
        )(x_ncl)

        # ---- Tiny host-side math: derive batch stats of y and fold BN ----
        m = jnp.float32(N * L)                       # true (unpadded) count
        mean_x = jnp.sum(sum_p, axis=(0, 1))[:, 0] / m        # (Cin,)
        exx = jnp.sum(gram_p, axis=(0, 1)) / m                # (Cin, Cin)
        cov_x = exx - jnp.outer(mean_x, mean_x)
        # TODO(synk): one-pass (Gram) covariance can lose precision for
        # large-mean activations; switch to a centered second pass if needed.
        var_y = jnp.maximum(jnp.einsum("ci,ij,cj->c", w2d, cov_x, w2d), 0.0)

        gamma = (jnp.ones((Cout,), jnp.float32) if bn_gamma is None
                 else bn_gamma.astype(jnp.float32))
        beta = (jnp.zeros((Cout,), jnp.float32) if bn_beta is None
                else bn_beta.astype(jnp.float32))
        scale = gamma * jax.lax.rsqrt(var_y + BN_EPS)          # (Cout,)
        w_fold = w2d * scale[:, None]
        # Conv bias cancels exactly against the BN mean subtraction.
        b_fold = beta - scale * (w2d @ mean_x)
    else:
        w_fold = w2d
        b_fold = conv_b.astype(jnp.float32)

    # ---- Pass 2: folded conv + bias + ReLU, lane-dense stores in NCL ----
    out = pl.pallas_call(
        _make_conv_kernel(BNb),
        out_shape=jax.ShapeDtypeStruct((N, Cout, L), x_ncl.dtype),
        grid=(num_nb, num_l),
        in_specs=[pl.BlockSpec((BNb, Cin, TL), lambda nb, l: (nb, 0, l)),
                  pl.BlockSpec((Cout, Cin), lambda nb, l: (0, 0)),
                  pl.BlockSpec((Cout, 1), lambda nb, l: (0, 0))],
        out_specs=pl.BlockSpec((BNb, Cout, TL), lambda nb, l: (nb, 0, l)),
        compiler_params=pltpu.CompilerParams(
            dimension_semantics=("parallel", "parallel"),
            vmem_limit_bytes=vmem_limit),
        cost_estimate=pl.CostEstimate(
            flops=2 * N * L * Cin * Cout,
            transcendentals=0,
            bytes_accessed=in_bytes * N * Cin * L + out_bytes * N * Cout * L
            + 4 * Cout * (Cin + 1)),
    )(x_ncl, w_fold, b_fold.reshape(Cout, 1))

    return out


def _reference(x_ncl, conv_w, conv_b, gamma, beta, with_bn=True):
    # Pure-JAX reference mirroring PyTorch semantics (training-mode BN).
    y = jnp.einsum("ncl,oc->nol", x_ncl, conv_w[:, :, 0]) + conv_b[None, :, None]
    if with_bn:
        mean = jnp.mean(y, axis=(0, 2), keepdims=True)
        var = jnp.mean((y - mean) ** 2, axis=(0, 2), keepdims=True)
        y = (y - mean) / jnp.sqrt(var + BN_EPS)
        y = y * gamma[None, :, None] + beta[None, :, None]
    return jnp.maximum(y, 0.0)


if __name__ == "__main__":
    key = jax.random.PRNGKey(0)
    k_x, k_w, k_b, k_g, k_bt, k_x2, k_x3 = jax.random.split(key, 7)

    N, Cin, L = 2, 4, 16       # small NCW input, consistent with Conv1d
    Cout = 8                   # output_dim

    x = jax.random.normal(k_x, (N, Cin, L), dtype=jnp.float32)

    # Synthetic parameters; shapes match nn.Conv1d / nn.BatchNorm1d.
    conv_w = jax.random.normal(k_w, (Cout, Cin, 1), dtype=jnp.float32) * 0.5
    conv_b = jax.random.normal(k_b, (Cout,), dtype=jnp.float32) * 0.1
    bn_gamma = 1.0 + 0.1 * jax.random.normal(k_g, (Cout,), dtype=jnp.float32)
    bn_beta = 0.1 * jax.random.normal(k_bt, (Cout,), dtype=jnp.float32)

    # Default plan, with_bn=True path.
    out = base_bc_forward(x, conv_w, conv_b, bn_gamma, bn_beta, with_bn=True)
    out = jax.block_until_ready(out)
    ref = _reference(x, conv_w, conv_b, bn_gamma, bn_beta, with_bn=True)
    assert out.shape == (N, Cout, L)
    assert jnp.allclose(out, ref, atol=2e-4, rtol=2e-4)

    # with_bn=False path (conv + bias + relu only).
    out_nb = base_bc_forward(x, conv_w, conv_b, with_bn=False)
    out_nb = jax.block_until_ready(out_nb)
    ref_nb = _reference(x, conv_w, conv_b, bn_gamma, bn_beta, with_bn=False)
    assert out_nb.shape == (N, Cout, L)
    assert jnp.allclose(out_nb, ref_nb, atol=2e-4, rtol=2e-4)

    # Ragged last L tile (exercises in-kernel masking / dropped edge stores).
    L2 = 200
    x2 = jax.random.normal(k_x2, (N, Cin, L2), dtype=jnp.float32)
    out2 = jax.block_until_ready(
        base_bc_forward(x2, conv_w, conv_b, bn_gamma, bn_beta, with_bn=True,
                        _tile_override=(1, 128)))
    ref2 = _reference(x2, conv_w, conv_b, bn_gamma, bn_beta, with_bn=True)
    assert out2.shape == (N, Cout, L2)
    assert jnp.allclose(out2, ref2, atol=2e-4, rtol=2e-4)

    # N==1 path (exercises the 2-way parallel L split in the stats pass).
    L3 = 256
    x3 = jax.random.normal(k_x3, (1, Cin, L3), dtype=jnp.float32)
    out3 = jax.block_until_ready(
        base_bc_forward(x3, conv_w, conv_b, bn_gamma, bn_beta, with_bn=True,
                        _tile_override=(1, 128)))
    ref3 = _reference(x3, conv_w, conv_b, bn_gamma, bn_beta, with_bn=True)
    assert out3.shape == (1, Cout, L3)
    assert jnp.allclose(out3, ref3, atol=2e-4, rtol=2e-4)

    print("KERNEL_OK")
</pallas_src>

<mosaic_0001>
module attributes {stable_mosaic.version = 11 : i64} {
  func.func @kernel(%arg0: i32, %arg1: i32, %arg2: i32, %arg3: memref<2x4x16xf32, #tpu.memory_space<vmem>>, %arg4: memref<1x1x4x1xf32, #tpu.memory_space<vmem>>, %arg5: memref<1x1x4x4xf32, #tpu.memory_space<vmem>>) attributes {dimension_semantics = [#tpu.dimension_semantics<parallel>, #tpu.dimension_semantics<parallel>, #tpu.dimension_semantics<arbitrary>], iteration_bounds = array<i64: 1, 1, 1>, scalar_prefetch = 0 : i64, scratch_operands = 0 : i64, tpu.core_type = #tpu.core_type<tc>, window_params = [{transform_indices = @transform_0, window_bounds = array<i64: 2, 4, 16>}, {transform_indices = @transform_1, window_bounds = array<i64: 1, 1, 4, 1>}, {transform_indices = @transform_2, window_bounds = array<i64: 1, 1, 4, 4>}]} {
    %c0_i32 = arith.constant 0 : i32
    %0 = arith.cmpi eq, %arg2, %c0_i32 : i32
    %1 = arith.extui %0 : i1 to i32
    %c0_i32_0 = arith.constant 0 : i32
    %2 = arith.cmpi ne, %1, %c0_i32_0 : i32
    scf.if %2 {
      %cst_26 = arith.constant 0.000000e+00 : f32
      %31 = vector.broadcast %cst_26 : f32 to vector<4x1xf32>
      %c0_27 = arith.constant 0 : index
      %c0_28 = arith.constant 0 : index
      %c0_29 = arith.constant 0 : index
      %c0_30 = arith.constant 0 : index
      %32 = vector.load %arg4[%c0_27, %c0_28, %c0_29, %c0_30] : memref<1x1x4x1xf32, #tpu.memory_space<vmem>>, vector<1x1x4x1xf32>
      %33 = vector.shape_cast %32 : vector<1x1x4x1xf32> to vector<4x1xf32>
      %34 = vector.shape_cast %31 : vector<4x1xf32> to vector<1x1x4x1xf32>
      tpu.vector_store %arg4[%c0_27, %c0_28, %c0_29, %c0_30], %34 {strides = array<i32>} : memref<1x1x4x1xf32, #tpu.memory_space<vmem>>, vector<1x1x4x1xf32>,
      %cst_31 = arith.constant 0.000000e+00 : f32
      %35 = vector.broadcast %cst_31 : f32 to vector<4x4xf32>
      %c0_32 = arith.constant 0 : index
      %c0_33 = arith.constant 0 : index
      %c0_34 = arith.constant 0 : index
      %c0_35 = arith.constant 0 : index
      %36 = vector.load %arg5[%c0_32, %c0_33, %c0_34, %c0_35] : memref<1x1x4x4xf32, #tpu.memory_space<vmem>>, vector<1x1x4x4xf32>
      %37 = vector.shape_cast %36 : vector<1x1x4x4xf32> to vector<4x4xf32>
      %38 = vector.shape_cast %35 : vector<4x4xf32> to vector<1x1x4x4xf32>
      tpu.vector_store %arg5[%c0_32, %c0_33, %c0_34, %c0_35], %38 {strides = array<i32>} : memref<1x1x4x4xf32, #tpu.memory_space<vmem>>, vector<1x1x4x4xf32>,
    } else {
    }
    %cst = arith.constant 0.000000e+00 : f32
    %3 = vector.broadcast %cst : f32 to vector<4x1xf32>
    %cst_1 = arith.constant 0.000000e+00 : f32
    %4 = vector.broadcast %cst_1 : f32 to vector<4x4xf32>
    %c0 = arith.constant 0 : index
    %c0_2 = arith.constant 0 : index
    %c0_3 = arith.constant 0 : index
    %5 = vector.load %arg3[%c0, %c0_2, %c0_3] : memref<2x4x16xf32, #tpu.memory_space<vmem>>, vector<1x4x16xf32>
    %6 = vector.shape_cast %5 : vector<1x4x16xf32> to vector<4x16xf32>
    %cst_4 = arith.constant dense<0.000000e+00> : vector<4xf32>
    %7 = vector.multi_reduction <add>, %6, %cst_4 [1] : vector<4x16xf32> to vector<4xf32>
    %8 = vector.shape_cast %7 : vector<4xf32> to vector<4x1xf32>
    %9 = arith.addf %3, %8 : vector<4x1xf32>
    %cst_5 = arith.constant dense<0.000000e+00> : vector<4x4xf32>
    %10 = tpu.matmul %6, %6, %cst_5 {dimension_numbers = #tpu.dot_dimension_numbers<[1], [1], [0], [0], [0, 0, 1, 0], [], []>} : vector<4x16xf32>, vector<4x16xf32>, vector<4x4xf32> -> vector<4x4xf32>
    %11 = arith.addf %4, %10 : vector<4x4xf32>
    %c1 = arith.constant 1 : index
    %c0_6 = arith.constant 0 : index
    %c0_7 = arith.constant 0 : index
    %12 = vector.load %arg3[%c1, %c0_6, %c0_7] : memref<2x4x16xf32, #tpu.memory_space<vmem>>, vector<1x4x16xf32>
    %13 = vector.shape_cast %12 : vector<1x4x16xf32> to vector<4x16xf32>
    %cst_8 = arith.constant dense<0.000000e+00> : vector<4xf32>
    %14 = vector.multi_reduction <add>, %13, %cst_8 [1] : vector<4x16xf32> to vector<4xf32>
    %15 = vector.shape_cast %14 : vector<4xf32> to vector<4x1xf32>
    %16 = arith.addf %9, %15 : vector<4x1xf32>
    %cst_9 = arith.constant dense<0.000000e+00> : vector<4x4xf32>
    %17 = tpu.matmul %13, %13, %cst_9 {dimension_numbers = #tpu.dot_dimension_numbers<[1], [1], [0], [0], [0, 0, 1, 0], [], []>} : vector<4x16xf32>, vector<4x16xf32>, vector<4x4xf32> -> vector<4x4xf32>
    %18 = arith.addf %11, %17 : vector<4x4xf32>
    %c0_10 = arith.constant 0 : index
    %c0_11 = arith.constant 0 : index
    %c0_12 = arith.constant 0 : index
    %c0_13 = arith.constant 0 : index
    %19 = vector.load %arg4[%c0_10, %c0_11, %c0_12, %c0_13] : memref<1x1x4x1xf32, #tpu.memory_space<vmem>>, vector<1x1x4x1xf32>
    %20 = vector.shape_cast %19 : vector<1x1x4x1xf32> to vector<4x1xf32>
    %21 = arith.addf %20, %16 : vector<4x1xf32>
    %c0_14 = arith.constant 0 : index
    %c0_15 = arith.constant 0 : index
    %c0_16 = arith.constant 0 : index
    %c0_17 = arith.constant 0 : index
    %22 = vector.load %arg4[%c0_14, %c0_15, %c0_16, %c0_17] : memref<1x1x4x1xf32, #tpu.memory_space<vmem>>, vector<1x1x4x1xf32>
    %23 = vector.shape_cast %22 : vector<1x1x4x1xf32> to vector<4x1xf32>
    %24 = vector.shape_cast %21 : vector<4x1xf32> to vector<1x1x4x1xf32>
    tpu.vector_store %arg4[%c0_14, %c0_15, %c0_16, %c0_17], %24 {strides = array<i32>} : memref<1x1x4x1xf32, #tpu.memory_space<vmem>>, vector<1x1x4x1xf32>,
    %c0_18 = arith.constant 0 : index
    %c0_19 = arith.constant 0 : index
    %c0_20 = arith.constant 0 : index
    %c0_21 = arith.constant 0 : index
    %25 = vector.load %arg5[%c0_18, %c0_19, %c0_20, %c0_21] : memref<1x1x4x4xf32, #tpu.memory_space<vmem>>, vector<1x1x4x4xf32>
    %26 = vector.shape_cast %25 : vector<1x1x4x4xf32> to vector<4x4xf32>
    %27 = arith.addf %26, %18 : vector<4x4xf32>
    %c0_22 = arith.constant 0 : index
    %c0_23 = arith.constant 0 : index
    %c0_24 = arith.constant 0 : index
    %c0_25 = arith.constant 0 : index
    %28 = vector.load %arg5[%c0_22, %c0_23, %c0_24, %c0_25] : memref<1x1x4x4xf32, #tpu.memory_space<vmem>>, vector<1x1x4x4xf32>
    %29 = vector.shape_cast %28 : vector<1x1x4x4xf32> to vector<4x4xf32>
    %30 = vector.shape_cast %27 : vector<4x4xf32> to vector<1x1x4x4xf32>
    tpu.vector_store %arg5[%c0_22, %c0_23, %c0_24, %c0_25], %30 {strides = array<i32>} : memref<1x1x4x4xf32, #tpu.memory_space<vmem>>, vector<1x1x4x4xf32>,
    return
  }
  func.func @transform_0(%arg0: i32, %arg1: i32, %arg2: i32) -> (i32, i32, i32) {
    %c1_i32 = arith.constant 1 : i32
    %0 = arith.muli %arg1, %c1_i32 : i32
    %1 = arith.addi %0, %arg2 : i32
    %c0_i32 = arith.constant 0 : i32
    %c0_i32_0 = arith.constant 0 : i32
    return %arg0, %c0_i32, %1 : i32, i32, i32
  }
  func.func @transform_1(%arg0: i32, %arg1: i32, %arg2: i32) -> (i32, i32, i32, i32) {
    %c0_i32 = arith.constant 0 : i32
    %c0_i32_0 = arith.constant 0 : i32
    %c0_i32_1 = arith.constant 0 : i32
    return %arg0, %arg1, %c0_i32, %c0_i32_0 : i32, i32, i32, i32
  }
  func.func @transform_2(%arg0: i32, %arg1: i32, %arg2: i32) -> (i32, i32, i32, i32) {
    %c0_i32 = arith.constant 0 : i32
    %c0_i32_0 = arith.constant 0 : i32
    %c0_i32_1 = arith.constant 0 : i32
    return %arg0, %arg1, %c0_i32, %c0_i32_0 : i32, i32, i32, i32
  }
}

</mosaic_0001>

<bundles_post_ra>
// kernel: tpu_custom_call.1
= control target key start
LH: loop header
LB: loop body
LE: loop exit
PB: predicated region body
PF: predicated region fallthrough
CT: control target
= control target key end

     0   :  { %8 = vsyncpa [#allocation3], 0  ;;  %s351_s0 = inlined_call_operand.hbm [shape: f32[2,4,16], index: 0, kind: input, shape index: {}]   ;;  %s352_s1 = inlined_call_operand.vmem [shape: f32[1,1,4,1], index: 1, kind: output, shape index: {0}]   ;;  %s353_s2 = inlined_call_operand.hbm [shape: f32[1,1,4,4], index: 2, kind: output, shape index: {1}]  }
   0x1   :  { %9 = vsyncpa [#allocation4], 0  ;;  %s295_s9 = smov [#allocation2]   ;;  %s247_s13 = scalar_lea.hbm %s351_s0, 128 }
   0x2   :  { %s18_s10 = sshll.u32 %s295_s9, 4  ;;  %p248_p0 = scmp.ne.s32.totalorder %s351_s0, %s247_s13  ;;  %s19_s10 = int_to_ptr.vmem [resolvable:$true] %s18_s10 }
   0x3   :  { %p251_p1 = scmp.lt.u32.totalorder %s247_s13, %s351_s0 }
   0x5   :  { %p253_p2 = pnand %p251_p1, %p248_p0 }
   0x7   :  { %256 = shalt.err (!%p253_p2)
}
   0x8   :  { %s257_s18 = scalar_lea.vmem %s19_s10, 128  ;;  %p262_p4 = scmp.lt.s32.totalorder %s19_s10, %s19_s10 }
   0x9   :  { %p258_p3 = scmp.ne.s32.totalorder %s19_s10, %s257_s18  ;;  %p263_p5 = scmp.lt.s32.totalorder %s257_s18, %s257_s18 }
   0xb   :  { %p264_p6 = por %p263_p5, %p262_p4 }
   0xd   :  { %p265_p7 = pnand %p264_p6, %p258_p3 }
   0xf   :  { %268 = shalt.err (!%p265_p7)
}
  0x10   :  { %s296_s19 = smov 64   ;;  %s297_s20 = smov 4  }
  0x11   :  { %24 = dma.hbm_to_vmem [thread:$0]  %s351_s0, 128, %s19_s10, [#allocation3], %s296_s19, %s296_s19, %s297_s20  }
  0x12   :  { %291 = dma.done.wait [#allocation3], 128  }
  0x13   :  { %292 = vsyncadd [#allocation3], 4294967168  ;;  %vm35_vm0 = vcmask 27648   ;;  %v298_v0 = vmov 0.0   ;;  %vm299_vm1 = vmmov 0   ;;  %vm49_vm2 = vcmask 130048  }
  0x14   :  { %36 = vst.msk [vmem:[#allocation5] sm:$0xf] %vm35_vm0, %v298_v0  ;;  %231 = vmatprep.subr.mxu0 %v298_v0  ;;  %236 = vmatprep.subr.mxu1 %v298_v0  ;;  %vm38_vm3 = vcmask 125952   ;;  %v44_v1 = vld [vmem:[#allocation2 + $0x4] sm:$0xf]  ;;  %vm33_vm4 = vcmask 3072  }
  0x15   :  { %233 = vmatprep.mubr.msk.f32.mxu0 %vm299_vm1, %v298_v0  ;;  %238 = vmatprep.mubr.msk.f32.mxu1 %vm299_vm1, %v298_v0  ;;  %v37_v2 = vld [vmem:[#allocation2] sm:$0xf]  ;;  %v45_v4 = vsel %vm38_vm3, %v44_v1, 0.0  ;;  %34 = vst.msk [vmem:[%s352_s1] sm:$0xf] %vm33_vm4, %v298_v0  ;;  %s300_s28 = smov [#allocation5]  }
  0x16   :  { %232 = vmatpush3.xpose.msk.msra.mxu0 %vm49_vm2, %v44_v1  ;;  %237 = vmatpush3.xpose.msk.msra.mxu1 %vm49_vm2, %v37_v2  ;;  %v39_v3 = vsel %vm38_vm3, %v37_v2, 0.0  ;;  %s212_s29 = sshll.u32 %s300_s28, 4  ;;  %s213_s29 = int_to_ptr.vmem [resolvable:$true] %s212_s29 }
  0x17   :  { %40 = vadd.xlane.f32.xlu0 %v39_v3  ;;  %s269_s30 = scalar_lea.vmem %s213_s29, 64  ;;  %p274_p9 = scmp.lt.s32.totalorder %s213_s29, %s213_s29 }
  0x18   :  { %p270_p8 = scmp.ne.s32.totalorder %s213_s29, %s269_s30  ;;  %p275_p10 = scmp.lt.s32.totalorder %s269_s30, %s269_s30 }
  0x19   :  { %234 = vmatmul.mubr.msk.f32.vlgmr.msra.gmra.mrb[0].mxu0 %vm49_vm2, %v44_v1  ;;  %239 = vmatmul.mubr.msk.f32.vlgmr.msra.gmra.mrb[0].mxu1 %vm49_vm2, %v37_v2 }
  0x1a   :  { %p276_p11 = por %p275_p10, %p274_p9 }
  0x1b   :  { %46 = vadd.xlane.f32.xlu0 %v45_v4  ;;  %v200_v12 = vld [vmem:[#allocation5] sm:$0xf] }
  0x1c   :  { %v196_v7 = vld [vmem:[%s352_s1] sm:$0xf]  ;;  %p277_p12 = pnand %p276_p11, %p270_p8 }
  0xa4   :  { %v41_v5 = vpop.xlane.xlu0 %40 }
  0xa8   :  { %v47_v6 = vpop.xlane.xlu0 %46 }
  0xa9   :  { %v48_v8 = vadd.f32 %v47_v6, %v41_v5 }
  0xab   :  { %v197_v9 = vadd.f32 %v196_v7, %v48_v8 }
  0xad   :  { %199 = vst.msk [vmem:[%s352_s1] sm:$0xf] %vm33_vm4, %v197_v9 }
  0xec   :  { %v119_v10 = vpop.f32.mrb[0].mxu0  ;;  %v192_v11 = vpop.f32.mrb[0].mxu1 }
  0xed   :  { %v193_v13 = vadd.f32 %v192_v11, %v119_v10  ;;  %v235_v14 = vpop.f32.mrb[1].mxu0  ;;  %v240_v15 = vpop.f32.mrb[1].mxu1 }
  0xef   :  { %v201_v16 = vadd.f32 %v200_v12, %v193_v13 }
  0xf1   :  { %203 = vst.msk [vmem:[#allocation5] sm:$0xf] %vm35_vm0, %v201_v16 }
  0xf2   :  { %280 = shalt.err (!%p277_p12)
}
  0xf3   :  { %s281_s4 = scalar_lea.hbm %s353_s2, 64 }
  0xf4   :  { %p282_p13 = scmp.ne.s32.totalorder %s353_s2, %s281_s4  ;;  %p285_p0 = scmp.lt.u32.totalorder %s281_s4, %s353_s2 }
  0xf6   :  { %p287_p1 = pnand %p285_p0, %p282_p13 }
  0xf8   :  { %290 = shalt.err (!%p287_p1)
}
  0xf9   :  { %215 = dma.vmem_to_hbm [thread:$0]  %s213_s29, 64, %s353_s2, [#allocation4]  }
  0xfa   :  { %293 = dma.done.wait [#allocation4], 64  }
  0xfb   :  { %294 = vsyncadd [#allocation4], 4294967232 }
  0xfc   :  { %221 = vsyncpa [#allocation3], 1 }
  0xfd   :  { %222 = vsyncpa [#allocation4], 1 }

</bundles_post_ra>
